<compile_context>
chip_gen: v6e
topology: v6e:2x2x1
jax: 0.10.0
libtpu: 0.0.40
codegen_flags: <defaults>
</compile_context>

<pallas_src>
import jax
import jax.numpy as jnp
from jax.experimental import pallas as pl
from jax.experimental.pallas import tpu as pltpu

_EPS = 1e-5

# Per-block caps (worst-case chip = v5e: 16 MiB default scoped VMEM, ~820 GB/s HBM).
# A (256, 2048) f32 block is 2 MiB; apply pass double-buffers input + output = 8 MiB.
_ROW_CAP = 256     # sublane-dim tile cap (multiple of 8)
_LANE_CAP = 2048   # lane-dim tile cap (multiple of 128); >=512 lanes ~ HBM roofline


def _pick_tile(size, cap, quantum):
    """Largest quantum-multiple tile <= cap that evenly divides `size` (else `size`)."""
    if size <= cap:
        return size
    t = (cap // quantum) * quantum
    while t >= quantum:
        if size % t == 0:
            return t
        t -= quantum
    # TODO(synk): no aligned divisor -> single full-extent block; a masked partial-tile
    #             path would be needed for huge prime-ish extents.
    return size


def _stats_kernel(x_ref, sum_ref, sumsq_ref):
    """Pass 1: one-pass per-row (n*c) sum / sum-of-squares, accumulated over tiles."""
    t = pl.program_id(1)

    @pl.when(t == 0)
    def _():
        sum_ref[...] = jnp.zeros_like(sum_ref)
        sumsq_ref[...] = jnp.zeros_like(sumsq_ref)

    x = x_ref[...].astype(jnp.float32)                    # native dtype in, f32 accum
    sum_ref[...] += jnp.sum(x, axis=1, keepdims=True)     # lane reduction (XLU)
    sumsq_ref[...] += jnp.sum(x * x, axis=1, keepdims=True)


def _apply_kernel(x_ref, scale_ref, shift_ref, o_ref):
    """Pass 2: fused BN + FiLM as one per-row FMA: out = x * scale + shift."""
    x = x_ref[...].astype(jnp.float32)
    o_ref[...] = (x * scale_ref[...] + shift_ref[...]).astype(o_ref.dtype)


def _as_nc(p, N, C):
    """Accept FiLM params shaped (), (C,), (N, C), (N, C, 1, 1), ... -> (N, C) f32."""
    p = jnp.asarray(p, jnp.float32)
    if p.size == 1:
        return jnp.broadcast_to(p.reshape(1, 1), (N, C))
    if p.size == C:
        return jnp.broadcast_to(p.reshape(1, C), (N, C))
    assert p.size == N * C, (
        f"FiLM factor/bias must broadcast to (N={N}, C={C}); got shape {p.shape}")
    return p.reshape(N, C)


@jax.jit
def film_forward(x_nchw, factor, bias):
    """x_nchw: (N, C, H, W) any float dtype; factor/bias broadcastable to (N, C, 1, 1)."""
    N, C, H, W = x_nchw.shape
    NC, HW = N * C, H * W

    # Contiguous, metadata-only reshape (no HBM transpose/pad, no dtype cast pass).
    x2 = x_nchw.reshape(NC, HW)

    row_t = _pick_tile(NC, _ROW_CAP, 8)
    lane_t = _pick_tile(HW, _LANE_CAP, 128)
    R, T = NC // row_t, HW // lane_t

    # ---- Pass 1: per-row sums (revisited output block across the reduction axis) ----
    row_sum, row_sumsq = pl.pallas_call(
        _stats_kernel,
        out_shape=(jax.ShapeDtypeStruct((NC, 1), jnp.float32),
                   jax.ShapeDtypeStruct((NC, 1), jnp.float32)),
        grid=(R, T),
        in_specs=[pl.BlockSpec((row_t, lane_t), lambda r, t: (r, t))],
        out_specs=(pl.BlockSpec((row_t, 1), lambda r, t: (r, 0)),
                   pl.BlockSpec((row_t, 1), lambda r, t: (r, 0))),
        compiler_params=pltpu.CompilerParams(
            dimension_semantics=("parallel", "arbitrary")),
    )(x2)

    # ---- Tiny glue (few KB): cross-N combine + fused-affine coefficients ----
    inv_count = 1.0 / float(N * HW)
    mean_c = jnp.sum(row_sum.reshape(N, C), axis=0) * inv_count       # (C,)
    ex2_c = jnp.sum(row_sumsq.reshape(N, C), axis=0) * inv_count      # (C,)
    var_c = jnp.maximum(ex2_c - mean_c * mean_c, 0.0)  # one-pass var; clamp cancellation
    inv_std_c = jax.lax.rsqrt(var_c + _EPS)

    f_nc = _as_nc(factor, N, C)
    b_nc = _as_nc(bias, N, C)
    scale_nc = f_nc * inv_std_c[None, :]                              # factor / std
    shift_nc = b_nc - mean_c[None, :] * scale_nc                      # bias - mean*scale
    scale = scale_nc.reshape(NC, 1)
    shift = shift_nc.reshape(NC, 1)

    # ---- Pass 2: stream tiles, out = x * scale + shift (fully parallel grid) ----
    out2 = pl.pallas_call(
        _apply_kernel,
        out_shape=jax.ShapeDtypeStruct((NC, HW), x_nchw.dtype),
        grid=(R, T),
        in_specs=[pl.BlockSpec((row_t, lane_t), lambda r, t: (r, t)),
                  # Tiny coefficients: block index changes only with r -> DMA'd once
                  # per row block (effectively VMEM-resident, not per-tile refetch).
                  pl.BlockSpec((row_t, 1), lambda r, t: (r, 0)),
                  pl.BlockSpec((row_t, 1), lambda r, t: (r, 0))],
        out_specs=pl.BlockSpec((row_t, lane_t), lambda r, t: (r, t)),
        compiler_params=pltpu.CompilerParams(
            dimension_semantics=("parallel", "parallel")),
    )(x2, scale, shift)

    return out2.reshape(N, C, H, W)


def _reference(x_nchw, factor, bias):
    """Pure-JAX reference: BatchNorm2d(affine=False, training) + FiLM."""
    N, C = x_nchw.shape[:2]
    xf = x_nchw.astype(jnp.float32)
    mean = jnp.mean(xf, axis=(0, 2, 3), keepdims=True)
    var = jnp.mean((xf - mean) ** 2, axis=(0, 2, 3), keepdims=True)
    normed = (xf - mean) / jnp.sqrt(var + _EPS)
    f = _as_nc(factor, N, C).reshape(N, C, 1, 1)
    b = _as_nc(bias, N, C).reshape(N, C, 1, 1)
    return normed * f + b


if __name__ == "__main__":
    key = jax.random.PRNGKey(0)
    k_x, k_f, k_b = jax.random.split(key, 3)

    N, C, H, W = 2, 4, 16, 16
    x = jax.random.normal(k_x, (N, C, H, W), jnp.float32)
    # FiLM conditioning parameters: per-sample, per-channel (the usual FiLM case).
    factor = 1.0 + 0.1 * jax.random.normal(k_f, (N, C), jnp.float32)
    bias = 0.1 * jax.random.normal(k_b, (N, C), jnp.float32)

    out = jax.block_until_ready(film_forward(x, factor, bias))
    ref = _reference(x, factor, bias)

    assert out.shape == (N, C, H, W)
    assert out.dtype == x.dtype
    assert jnp.allclose(out, ref, atol=1e-4, rtol=1e-4), "mismatch vs reference"

    print("KERNEL_OK")
</pallas_src>

<mosaic_0001>
module attributes {stable_mosaic.version = 11 : i64} {
  func.func @_stats_kernel(%arg0: i32, %arg1: i32, %arg2: memref<8x256xf32, #tpu.memory_space<vmem>>, %arg3: memref<8x1xf32, #tpu.memory_space<vmem>>, %arg4: memref<8x1xf32, #tpu.memory_space<vmem>>) attributes {dimension_semantics = [#tpu.dimension_semantics<parallel>, #tpu.dimension_semantics<arbitrary>], iteration_bounds = array<i64: 1, 1>, scalar_prefetch = 0 : i64, scratch_operands = 0 : i64, tpu.core_type = #tpu.core_type<tc>, window_params = [{transform_indices = @transform_0, window_bounds = array<i64: 8, 256>}, {transform_indices = @transform_1, window_bounds = array<i64: 8, 1>}, {transform_indices = @transform_2, window_bounds = array<i64: 8, 1>}]} {
    %c0_i32 = arith.constant 0 : i32
    %0 = arith.cmpi eq, %arg1, %c0_i32 : i32
    %1 = arith.extui %0 : i1 to i32
    %c0_i32_0 = arith.constant 0 : i32
    %2 = arith.cmpi ne, %1, %c0_i32_0 : i32
    scf.if %2 {
      %cst_11 = arith.constant 0.000000e+00 : f32
      %15 = vector.broadcast %cst_11 : f32 to vector<8x1xf32>
      %c0_12 = arith.constant 0 : index
      %c0_13 = arith.constant 0 : index
      %16 = vector.load %arg3[%c0_12, %c0_13] : memref<8x1xf32, #tpu.memory_space<vmem>>, vector<8x1xf32>
      tpu.vector_store %arg3[%c0_12, %c0_13], %15 {strides = array<i32>} : memref<8x1xf32, #tpu.memory_space<vmem>>, vector<8x1xf32>,
      %cst_14 = arith.constant 0.000000e+00 : f32
      %17 = vector.broadcast %cst_14 : f32 to vector<8x1xf32>
      %c0_15 = arith.constant 0 : index
      %c0_16 = arith.constant 0 : index
      %18 = vector.load %arg4[%c0_15, %c0_16] : memref<8x1xf32, #tpu.memory_space<vmem>>, vector<8x1xf32>
      tpu.vector_store %arg4[%c0_15, %c0_16], %17 {strides = array<i32>} : memref<8x1xf32, #tpu.memory_space<vmem>>, vector<8x1xf32>,
    } else {
    }
    %c0 = arith.constant 0 : index
    %c0_1 = arith.constant 0 : index
    %3 = vector.load %arg2[%c0, %c0_1] : memref<8x256xf32, #tpu.memory_space<vmem>>, vector<8x256xf32>
    %c0_2 = arith.constant 0 : index
    %c0_3 = arith.constant 0 : index
    %4 = vector.load %arg3[%c0_2, %c0_3] : memref<8x1xf32, #tpu.memory_space<vmem>>, vector<8x1xf32>
    %cst = arith.constant dense<0.000000e+00> : vector<8xf32>
    %5 = vector.multi_reduction <add>, %3, %cst [1] : vector<8x256xf32> to vector<8xf32>
    %6 = vector.shape_cast %5 : vector<8xf32> to vector<8x1xf32>
    %7 = arith.addf %4, %6 : vector<8x1xf32>
    %c0_4 = arith.constant 0 : index
    %c0_5 = arith.constant 0 : index
    %8 = vector.load %arg3[%c0_4, %c0_5] : memref<8x1xf32, #tpu.memory_space<vmem>>, vector<8x1xf32>
    tpu.vector_store %arg3[%c0_4, %c0_5], %7 {strides = array<i32>} : memref<8x1xf32, #tpu.memory_space<vmem>>, vector<8x1xf32>,
    %c0_6 = arith.constant 0 : index
    %c0_7 = arith.constant 0 : index
    %9 = vector.load %arg4[%c0_6, %c0_7] : memref<8x1xf32, #tpu.memory_space<vmem>>, vector<8x1xf32>
    %10 = arith.mulf %3, %3 : vector<8x256xf32>
    %cst_8 = arith.constant dense<0.000000e+00> : vector<8xf32>
    %11 = vector.multi_reduction <add>, %10, %cst_8 [1] : vector<8x256xf32> to vector<8xf32>
    %12 = vector.shape_cast %11 : vector<8xf32> to vector<8x1xf32>
    %13 = arith.addf %9, %12 : vector<8x1xf32>
    %c0_9 = arith.constant 0 : index
    %c0_10 = arith.constant 0 : index
    %14 = vector.load %arg4[%c0_9, %c0_10] : memref<8x1xf32, #tpu.memory_space<vmem>>, vector<8x1xf32>
    tpu.vector_store %arg4[%c0_9, %c0_10], %13 {strides = array<i32>} : memref<8x1xf32, #tpu.memory_space<vmem>>, vector<8x1xf32>,
    return
  }
  func.func @transform_0(%arg0: i32, %arg1: i32) -> (i32, i32) {
    %c0_i32 = arith.constant 0 : i32
    return %arg0, %arg1 : i32, i32
  }
  func.func @transform_1(%arg0: i32, %arg1: i32) -> (i32, i32) {
    %c0_i32 = arith.constant 0 : i32
    %c0_i32_0 = arith.constant 0 : i32
    return %arg0, %c0_i32 : i32, i32
  }
  func.func @transform_2(%arg0: i32, %arg1: i32) -> (i32, i32) {
    %c0_i32 = arith.constant 0 : i32
    %c0_i32_0 = arith.constant 0 : i32
    return %arg0, %c0_i32 : i32, i32
  }
}

module attributes {stable_mosaic.version = 11 : i64} {
  func.func @_apply_kernel(%arg0: i32, %arg1: i32, %arg2: memref<8x256xf32, #tpu.memory_space<vmem>>, %arg3: memref<8x1xf32, #tpu.memory_space<vmem>>, %arg4: memref<8x1xf32, #tpu.memory_space<vmem>>, %arg5: memref<8x256xf32, #tpu.memory_space<vmem>>) attributes {dimension_semantics = [#tpu.dimension_semantics<parallel>, #tpu.dimension_semantics<parallel>], iteration_bounds = array<i64: 1, 1>, scalar_prefetch = 0 : i64, scratch_operands = 0 : i64, tpu.core_type = #tpu.core_type<tc>, window_params = [{transform_indices = @transform_0, window_bounds = array<i64: 8, 256>}, {transform_indices = @transform_1, window_bounds = array<i64: 8, 1>}, {transform_indices = @transform_2, window_bounds = array<i64: 8, 1>}, {transform_indices = @transform_3, window_bounds = array<i64: 8, 256>}]} {
    %c0 = arith.constant 0 : index
    %c0_0 = arith.constant 0 : index
    %0 = vector.load %arg2[%c0, %c0_0] : memref<8x256xf32, #tpu.memory_space<vmem>>, vector<8x256xf32>
    %c0_1 = arith.constant 0 : index
    %c0_2 = arith.constant 0 : index
    %1 = vector.load %arg3[%c0_1, %c0_2] : memref<8x1xf32, #tpu.memory_space<vmem>>, vector<8x1xf32>
    %2 = vector.broadcast %1 : vector<8x1xf32> to vector<8x256xf32>
    %3 = arith.mulf %0, %2 : vector<8x256xf32>
    %c0_3 = arith.constant 0 : index
    %c0_4 = arith.constant 0 : index
    %4 = vector.load %arg4[%c0_3, %c0_4] : memref<8x1xf32, #tpu.memory_space<vmem>>, vector<8x1xf32>
    %5 = vector.broadcast %4 : vector<8x1xf32> to vector<8x256xf32>
    %6 = arith.addf %3, %5 : vector<8x256xf32>
    %c0_5 = arith.constant 0 : index
    %c0_6 = arith.constant 0 : index
    %7 = vector.load %arg5[%c0_5, %c0_6] : memref<8x256xf32, #tpu.memory_space<vmem>>, vector<8x256xf32>
    tpu.vector_store %arg5[%c0_5, %c0_6], %6 {strides = array<i32>} : memref<8x256xf32, #tpu.memory_space<vmem>>, vector<8x256xf32>,
    return
  }
  func.func @transform_0(%arg0: i32, %arg1: i32) -> (i32, i32) {
    %c0_i32 = arith.constant 0 : i32
    return %arg0, %arg1 : i32, i32
  }
  func.func @transform_1(%arg0: i32, %arg1: i32) -> (i32, i32) {
    %c0_i32 = arith.constant 0 : i32
    %c0_i32_0 = arith.constant 0 : i32
    return %arg0, %c0_i32 : i32, i32
  }
  func.func @transform_2(%arg0: i32, %arg1: i32) -> (i32, i32) {
    %c0_i32 = arith.constant 0 : i32
    %c0_i32_0 = arith.constant 0 : i32
    return %arg0, %c0_i32 : i32, i32
  }
  func.func @transform_3(%arg0: i32, %arg1: i32) -> (i32, i32) {
    %c0_i32 = arith.constant 0 : i32
    return %arg0, %arg1 : i32, i32
  }
}

</mosaic_0001>

<bundles_post_ra>
// kernel: film_forward.2
= control target key start
LH: loop header
LB: loop body
LE: loop exit
PB: predicated region body
PF: predicated region fallthrough
CT: control target
= control target key end

     0   :  { %vm14_vm0 = vcmask 7168   ;;  %v43_v2 = vmov 0.0   ;;  %s87_s0 = inlined_call_operand.vmem [shape: f32[8,256], index: 0, kind: input, shape index: {}]   ;;  %s88_s1 = inlined_call_operand.vmem [shape: f32[8,1], index: 1, kind: output, shape index: {0}]   ;;  %s89_s2 = inlined_call_operand.vmem [shape: f32[8,1], index: 2, kind: output, shape index: {1}]  }
   0x1   :  { %v17_v0 = vld [vmem:[%s87_s0] sm:$0xff]  ;;  %v18_v1 = vld [vmem:[%s87_s0 + $0x8] sm:$0xff]  ;;  %15 = vst.msk [vmem:[%s88_s1] sm:$0xff] %vm14_vm0, %v43_v2  ;;  %16 = vst.msk [vmem:[%s89_s2] sm:$0xff] %vm14_vm0, %v43_v2 }
   0x2   :  { %v20_v3 = vadd.f32 %v18_v1, %v17_v0  ;;  %v27_v4 = vmul.f32 %v17_v0, %v17_v0  ;;  %v28_v5 = vmul.f32 %v18_v1, %v18_v1 }
   0x4   :  { %21 = vadd.xlane.f32.xlu0 %v20_v3  ;;  %v29_v6 = vadd.f32 %v28_v5, %v27_v4 }
   0x8   :  { %30 = vadd.xlane.f32.xlu0 %v29_v6  ;;  %v19_v7 = vld [vmem:[%s88_s1] sm:$0xff] }
   0x9   :  { %v26_v10 = vld [vmem:[%s89_s2] sm:$0xff] }
  0x8d   :  { %v22_v8 = vpop.xlane.xlu0 %21 }
  0x8e   :  { %v23_v9 = vadd.f32 %v22_v8, %v19_v7 }
  0x90   :  { %25 = vst.msk [vmem:[%s88_s1] sm:$0xff] %vm14_vm0, %v23_v9 }
  0x91   :  { %v31_v11 = vpop.xlane.xlu0 %30 }
  0x92   :  { %v32_v12 = vadd.f32 %v31_v11, %v26_v10 }
  0x94   :  { %33 = vst.msk [vmem:[%s89_s2] sm:$0xff] %vm14_vm0, %v32_v12 }

// kernel: film_forward.3
= control target key start
LH: loop header
LB: loop body
LE: loop exit
PB: predicated region body
PF: predicated region fallthrough
CT: control target
= control target key end

     0   :  { %v40_v0 = vmov 0   ;;  %s79_s1 = inlined_call_operand.vmem [shape: f32[8,1], index: 1, kind: input, shape index: {}]   ;;  %s80_s2 = inlined_call_operand.vmem [shape: f32[8,1], index: 2, kind: input, shape index: {}]   ;;  %s81_s0 = inlined_call_operand.vmem [shape: f32[8,256], index: 0, kind: input, shape index: {}]   ;;  %s82_s3 = inlined_call_operand.vmem [shape: f32[8,256], index: 3, kind: output, shape index: {}]  }
   0x1   :  { %39 = vset.pattern.permute.xlu0 %v40_v0  ;;  %v16_v1 = vld [vmem:[%s79_s1] sm:$0xff]  ;;  %v15_v5 = vld [vmem:[%s81_s0 + $0x8] sm:$0xff] }
   0x2   :  { %19 = vperm.xlu0 %39, %v16_v1   ;;  %v24_v2 = vld [vmem:[%s80_s2] sm:$0xff] }
   0x3   :  { %v14_v4 = vld [vmem:[%s81_s0] sm:$0xff] }
   0x6   :  { %27 = vperm.xlu0 %39, %v24_v2  }
  0x7d   :  { %v20_v3 = vpop.permute.xlu0 %19 }
  0x7e   :  { %v22_v6 = vmul.f32 %v20_v3, %v14_v4  ;;  %v23_v7 = vmul.f32 %v20_v3, %v15_v5 }
  0x81   :  { %v28_v8 = vpop.permute.xlu0 %27 }
  0x82   :  { %v30_v9 = vadd.f32 %v28_v8, %v22_v6  ;;  %v31_v10 = vadd.f32 %v28_v8, %v23_v7 }
  0x84   :  { %32 = vst [vmem:[%s82_s3] sm:$0xff] %v30_v9  ;;  %33 = vst [vmem:[%s82_s3 + $0x8] sm:$0xff] %v31_v10 }

</bundles_post_ra>
